<compile_context>
chip_gen: v6e
topology: v6e:2x2x1
jax: 0.10.0
libtpu: 0.0.40
codegen_flags: <defaults>
</compile_context>

<pallas_src>
import functools
import math

import jax
import jax.numpy as jnp
from jax.experimental import pallas as pl
from jax.experimental.pallas import tpu as pltpu


def _concat_dma_kernel(*refs, col_offsets, chunks, core_assign, num_cores):
    """refs = (*in_hbm_refs, out_hbm_ref, dma_sems).

    Pure-DMA concat on 2-D collapsed views: each input chunk is copied HBM->HBM
    directly into its static (disjoint) rectangle of the output. All copies are
    started first so they overlap, then all are waited on.
    """
    sems = refs[-1]
    out_ref = refs[-2]
    in_refs = refs[:-2]

    def make_copy(k, c):
        r0, rl, c0, cl = chunks[k][c]          # all static Python ints
        off = col_offsets[k] + c0
        return pltpu.make_async_copy(
            in_refs[k].at[r0:r0 + rl, c0:c0 + cl],
            out_ref.at[r0:r0 + rl, off:off + cl],
            sems.at[k, c],
        )

    if num_cores <= 1:
        copies = [make_copy(k, c)
                  for k in range(len(in_refs))
                  for c in range(len(chunks[k]))]
        for cp in copies:
            cp.start()
        for cp in copies:
            cp.wait()
    else:
        # Megacore (v7x): each core issues/waits its assigned chunks only.
        pid = pl.program_id(0)
        for k in range(len(in_refs)):
            for c in range(len(chunks[k])):
                @pl.when(pid == core_assign[k][c])
                def _start(k=k, c=c):
                    make_copy(k, c).start()
        for k in range(len(in_refs)):
            for c in range(len(chunks[k])):
                @pl.when(pid == core_assign[k][c])
                def _wait(k=k, c=c):
                    make_copy(k, c).wait()


def _chip_tuning():
    """(desired chunks per input, usable TensorCores) from the device kind."""
    try:
        kind = jax.devices()[0].device_kind.lower()
    except Exception:  # pragma: no cover - defensive
        kind = ""
    if "v5" in kind:
        return 2, 1          # ~0.8 TB/s: 2-3 outstanding DMAs already saturate
    if "v6" in kind:
        return 4, 1          # ~1.4 TB/s
    if "v7" in kind or "7x" in kind:
        return 8, 2          # ~3.2 TB/s shared by 2 TCs
    return 4, 1


def _split(n_total, n_parts, align=1):
    """Split [0, n_total) into <= n_parts disjoint (start, length) ranges."""
    if align > 1:
        n_parts = min(n_parts, max(1, n_total // align))
    n_parts = max(1, min(n_parts, n_total))
    bounds = []
    for i in range(n_parts + 1):
        b = (n_total * i) // n_parts
        if align > 1:
            b = (b // align) * align
        bounds.append(b)
    bounds[-1] = n_total
    out = []
    for i in range(n_parts):
        s, e = bounds[i], bounds[i + 1]
        if e > s:
            out.append((s, e - s))
    return out


_MIN_BYTES_TO_CHUNK = 1 << 20  # below this, DMA start/descriptor cost dominates


def _make_chunks(outer, cols, itemsize, n_desired):
    """Chunks of one input's 2-D view as (row0, nrows, col0, ncols) tuples."""
    if n_desired <= 1 or outer * cols * itemsize < _MIN_BYTES_TO_CHUNK:
        return ((0, outer, 0, cols),)
    if outer >= n_desired:
        return tuple((r0, rl, 0, cols) for r0, rl in _split(outer, n_desired))
    # Batch too small to split by rows: split 128-aligned column ranges instead.
    return tuple((0, outer, c0, cl) for c0, cl in _split(cols, n_desired, align=128))


def concat_pallas(xs, dimension=1):
    """Concatenate a list of arrays along `dimension` (torch.cat semantics)."""
    xs = list(xs)
    assert len(xs) >= 1, "torch.cat requires at least one tensor"
    ndim = xs[0].ndim
    axis = dimension % ndim

    # torch.cat-style dtype handling: promote everything to a common dtype.
    # TODO(synk): fuse this cast into the copy (VMEM bounce + VPU cast) instead
    # of a separate astype pass for mixed-dtype inputs.
    dtype = jnp.result_type(*[x.dtype for x in xs])
    xs = [x if x.dtype == dtype else x.astype(dtype) for x in xs]

    ref_shape = list(xs[0].shape)
    for x in xs:
        assert x.ndim == ndim, "all inputs must have the same rank"
        for d in range(ndim):
            if d != axis:
                assert x.shape[d] == ref_shape[d], "non-concat dims must match"

    # Drop empty-along-axis inputs (they contribute nothing).
    xs = [x for x in xs if x.shape[axis] > 0]
    sizes = [int(x.shape[axis]) for x in xs]
    offsets, off = [], 0
    for s in sizes:
        offsets.append(off)
        off += s
    total = off

    out_shape = list(ref_shape)
    out_shape[axis] = total
    out_shape = tuple(out_shape)

    if not xs:
        return jnp.zeros(out_shape, dtype)
    if len(xs) == 1:
        return xs[0]

    # Collapse dims around the concat axis: (outer, size_k*inner) per input and
    # (outer, total*inner) for the output -> lane-dense 2-D strided DMAs.
    outer = math.prod(ref_shape[:axis]) if axis > 0 else 1
    inner = math.prod(ref_shape[axis + 1:]) if axis + 1 < ndim else 1
    if outer == 0 or inner == 0 or total == 0:
        return jnp.zeros(out_shape, dtype)

    xs2d = [x.reshape(outer, s * inner) for x, s in zip(xs, sizes)]
    col_offsets = tuple(o * inner for o in offsets)
    total_cols = total * inner

    itemsize = jnp.dtype(dtype).itemsize
    n_desired, num_cores = _chip_tuning()
    chunks = tuple(_make_chunks(outer, s * inner, itemsize, n_desired) for s in sizes)
    max_chunks = max(len(c) for c in chunks)

    # Round-robin chunk -> core assignment (only used when num_cores > 1).
    core_assign, g = [], 0
    for c in chunks:
        row = []
        for _ in c:
            row.append(g % num_cores)
            g += 1
        core_assign.append(tuple(row))
    core_assign = tuple(core_assign)

    kernel = functools.partial(
        _concat_dma_kernel,
        col_offsets=col_offsets,
        chunks=chunks,
        core_assign=core_assign,
        num_cores=num_cores,
    )

    in_bytes = sum(x.size * itemsize for x in xs2d)
    cost = pl.CostEstimate(flops=0, transcendentals=0,
                           bytes_accessed=2 * int(in_bytes))

    call_kwargs = dict(
        out_shape=jax.ShapeDtypeStruct((outer, total_cols), dtype),
        in_specs=[pl.BlockSpec(memory_space=pl.ANY) for _ in xs2d],
        out_specs=pl.BlockSpec(memory_space=pl.ANY),
        scratch_shapes=[pltpu.SemaphoreType.DMA((len(xs2d), max_chunks))],
        cost_estimate=cost,
    )
    if num_cores > 1:
        call_kwargs["grid"] = (num_cores,)
        call_kwargs["compiler_params"] = pltpu.CompilerParams(
            dimension_semantics=("parallel",))

    out2d = pl.pallas_call(kernel, **call_kwargs)(*xs2d)
    return out2d.reshape(out_shape)


class Concat:
    """JAX/Pallas equivalent of ultralytics Concat (no parameters)."""

    def __init__(self, dimension=1):
        self.d = dimension

    def __call__(self, x):
        return concat_pallas(x, self.d)


if __name__ == "__main__":
    key = jax.random.PRNGKey(0)
    k1, k2, k3, k4, k5 = jax.random.split(key, 5)

    # Small NCHW inputs with differing channel counts (typical YOLO neck concat).
    x1 = jax.random.normal(k1, (2, 4, 16, 16), dtype=jnp.float32)
    x2 = jax.random.normal(k2, (2, 6, 16, 16), dtype=jnp.float32)
    x3 = jax.random.normal(k3, (2, 2, 16, 16), dtype=jnp.float32)

    mod = Concat(dimension=1)
    out = jax.block_until_ready(mod([x1, x2, x3]))
    ref = jnp.concatenate([x1, x2, x3], axis=1)
    assert out.shape == (2, 12, 16, 16)
    assert jnp.array_equal(out, ref)

    # Batch-dim concat (dimension=0) uses the same pure-DMA path (fully contiguous).
    mod0 = Concat(dimension=0)
    out0 = jax.block_until_ready(mod0([x1, x1]))
    ref0 = jnp.concatenate([x1, x1], axis=0)
    assert out0.shape == (4, 4, 16, 16)
    assert jnp.array_equal(out0, ref0)

    # Larger inputs to exercise the multi-chunk (multiple outstanding DMAs) path.
    xa = jax.random.normal(k4, (2, 64, 64, 64), dtype=jnp.float32)
    xb = jax.random.normal(k5, (2, 32, 64, 64), dtype=jnp.float32)
    outl = jax.block_until_ready(mod([xa, xb]))
    refl = jnp.concatenate([xa, xb], axis=1)
    assert outl.shape == (2, 96, 64, 64)
    assert jnp.array_equal(outl, refl)

    # Mixed dtypes promote like torch.cat (wrapper-side cast path for now).
    x2_bf16 = x2.astype(jnp.bfloat16)
    outm = jax.block_until_ready(mod([x1, x2_bf16]))
    refm = jnp.concatenate([x1, x2_bf16.astype(jnp.float32)], axis=1)
    assert outm.dtype == jnp.float32
    assert jnp.array_equal(outm, refm)

    print("KERNEL_OK")
</pallas_src>

<mosaic_0001>
module attributes {stable_mosaic.version = 11 : i64} {
  func.func @_concat_dma_kernel(%arg0: memref<2x1024xf32, #tpu.memory_space<any>>, %arg1: memref<2x1536xf32, #tpu.memory_space<any>>, %arg2: memref<2x512xf32, #tpu.memory_space<any>>, %arg3: memref<2x3072xf32, #tpu.memory_space<any>>, %arg4: memref<3x1x!tpu.dma_semaphore, #tpu.memory_space<semaphore_mem>>) attributes {dimension_semantics = [], scalar_prefetch = 0 : i64, scratch_operands = 1 : i64, tpu.core_type = #tpu.core_type<tc>} {
    %c0_i32 = arith.constant 0 : i32
    %c0_i32_0 = arith.constant 0 : i32
    %c0_i32_1 = arith.constant 0 : i32
    %c0_i32_2 = arith.constant 0 : i32
    %0 = tpu.memref_slice %arg0[%c0_i32_1, %c0_i32_2] : memref<2x1024xf32, #tpu.memory_space<any>> -> memref<2x1024xf32, #tpu.memory_space<any>>
    %c0_i32_3 = arith.constant 0 : i32
    %c0_i32_4 = arith.constant 0 : i32
    %1 = tpu.memref_slice %arg3[%c0_i32_3, %c0_i32_4] : memref<2x3072xf32, #tpu.memory_space<any>> -> memref<2x1024xf32, #tpu.memory_space<any>>
    %2 = tpu.memref_slice %arg4[%c0_i32, %c0_i32_0] : memref<3x1x!tpu.dma_semaphore, #tpu.memory_space<semaphore_mem>> -> memref<1x1x!tpu.dma_semaphore, #tpu.memory_space<semaphore_mem>>
    %3 = tpu.memref_squeeze %2 : memref<1x1x!tpu.dma_semaphore, #tpu.memory_space<semaphore_mem>> -> memref<!tpu.dma_semaphore, #tpu.memory_space<semaphore_mem>>
    tpu.enqueue_dma source(%0 : memref<2x1024xf32, #tpu.memory_space<any>>) target(%1 : memref<2x1024xf32, #tpu.memory_space<any>>) target_semaphore(%3 : memref<!tpu.dma_semaphore, #tpu.memory_space<semaphore_mem>>)
    %c1_i32 = arith.constant 1 : i32
    %c0_i32_5 = arith.constant 0 : i32
    %c0_i32_6 = arith.constant 0 : i32
    %c0_i32_7 = arith.constant 0 : i32
    %4 = tpu.memref_slice %arg1[%c0_i32_6, %c0_i32_7] : memref<2x1536xf32, #tpu.memory_space<any>> -> memref<2x1536xf32, #tpu.memory_space<any>>
    %c0_i32_8 = arith.constant 0 : i32
    %c1024_i32 = arith.constant 1024 : i32
    %5 = tpu.memref_slice %arg3[%c0_i32_8, %c1024_i32] : memref<2x3072xf32, #tpu.memory_space<any>> -> memref<2x1536xf32, #tpu.memory_space<any>>
    %6 = tpu.memref_slice %arg4[%c1_i32, %c0_i32_5] : memref<3x1x!tpu.dma_semaphore, #tpu.memory_space<semaphore_mem>> -> memref<1x1x!tpu.dma_semaphore, #tpu.memory_space<semaphore_mem>>
    %7 = tpu.memref_squeeze %6 : memref<1x1x!tpu.dma_semaphore, #tpu.memory_space<semaphore_mem>> -> memref<!tpu.dma_semaphore, #tpu.memory_space<semaphore_mem>>
    tpu.enqueue_dma source(%4 : memref<2x1536xf32, #tpu.memory_space<any>>) target(%5 : memref<2x1536xf32, #tpu.memory_space<any>>) target_semaphore(%7 : memref<!tpu.dma_semaphore, #tpu.memory_space<semaphore_mem>>)
    %c2_i32 = arith.constant 2 : i32
    %c0_i32_9 = arith.constant 0 : i32
    %c0_i32_10 = arith.constant 0 : i32
    %c0_i32_11 = arith.constant 0 : i32
    %8 = tpu.memref_slice %arg2[%c0_i32_10, %c0_i32_11] : memref<2x512xf32, #tpu.memory_space<any>> -> memref<2x512xf32, #tpu.memory_space<any>>
    %c0_i32_12 = arith.constant 0 : i32
    %c2560_i32 = arith.constant 2560 : i32
    %9 = tpu.memref_slice %arg3[%c0_i32_12, %c2560_i32] : memref<2x3072xf32, #tpu.memory_space<any>> -> memref<2x512xf32, #tpu.memory_space<any>>
    %10 = tpu.memref_slice %arg4[%c2_i32, %c0_i32_9] : memref<3x1x!tpu.dma_semaphore, #tpu.memory_space<semaphore_mem>> -> memref<1x1x!tpu.dma_semaphore, #tpu.memory_space<semaphore_mem>>
    %11 = tpu.memref_squeeze %10 : memref<1x1x!tpu.dma_semaphore, #tpu.memory_space<semaphore_mem>> -> memref<!tpu.dma_semaphore, #tpu.memory_space<semaphore_mem>>
    tpu.enqueue_dma source(%8 : memref<2x512xf32, #tpu.memory_space<any>>) target(%9 : memref<2x512xf32, #tpu.memory_space<any>>) target_semaphore(%11 : memref<!tpu.dma_semaphore, #tpu.memory_space<semaphore_mem>>)
    %c0_i32_13 = arith.constant 0 : i32
    %c0_i32_14 = arith.constant 0 : i32
    %c0_i32_15 = arith.constant 0 : i32
    %c0_i32_16 = arith.constant 0 : i32
    %12 = tpu.memref_slice %arg0[%c0_i32_15, %c0_i32_16] : memref<2x1024xf32, #tpu.memory_space<any>> -> memref<2x1024xf32, #tpu.memory_space<any>>
    %c0_i32_17 = arith.constant 0 : i32
    %c0_i32_18 = arith.constant 0 : i32
    %13 = tpu.memref_slice %arg3[%c0_i32_17, %c0_i32_18] : memref<2x3072xf32, #tpu.memory_space<any>> -> memref<2x1024xf32, #tpu.memory_space<any>>
    %14 = tpu.memref_slice %arg4[%c0_i32_13, %c0_i32_14] : memref<3x1x!tpu.dma_semaphore, #tpu.memory_space<semaphore_mem>> -> memref<1x1x!tpu.dma_semaphore, #tpu.memory_space<semaphore_mem>>
    %15 = tpu.memref_squeeze %14 : memref<1x1x!tpu.dma_semaphore, #tpu.memory_space<semaphore_mem>> -> memref<!tpu.dma_semaphore, #tpu.memory_space<semaphore_mem>>
    tpu.wait_dma2 semaphore(%15 : memref<!tpu.dma_semaphore, #tpu.memory_space<semaphore_mem>>) src(%12 : memref<2x1024xf32, #tpu.memory_space<any>>) dst(%13 : memref<2x1024xf32, #tpu.memory_space<any>>)
    %c1_i32_19 = arith.constant 1 : i32
    %c0_i32_20 = arith.constant 0 : i32
    %c0_i32_21 = arith.constant 0 : i32
    %c0_i32_22 = arith.constant 0 : i32
    %16 = tpu.memref_slice %arg1[%c0_i32_21, %c0_i32_22] : memref<2x1536xf32, #tpu.memory_space<any>> -> memref<2x1536xf32, #tpu.memory_space<any>>
    %c0_i32_23 = arith.constant 0 : i32
    %c1024_i32_24 = arith.constant 1024 : i32
    %17 = tpu.memref_slice %arg3[%c0_i32_23, %c1024_i32_24] : memref<2x3072xf32, #tpu.memory_space<any>> -> memref<2x1536xf32, #tpu.memory_space<any>>
    %18 = tpu.memref_slice %arg4[%c1_i32_19, %c0_i32_20] : memref<3x1x!tpu.dma_semaphore, #tpu.memory_space<semaphore_mem>> -> memref<1x1x!tpu.dma_semaphore, #tpu.memory_space<semaphore_mem>>
    %19 = tpu.memref_squeeze %18 : memref<1x1x!tpu.dma_semaphore, #tpu.memory_space<semaphore_mem>> -> memref<!tpu.dma_semaphore, #tpu.memory_space<semaphore_mem>>
    tpu.wait_dma2 semaphore(%19 : memref<!tpu.dma_semaphore, #tpu.memory_space<semaphore_mem>>) src(%16 : memref<2x1536xf32, #tpu.memory_space<any>>) dst(%17 : memref<2x1536xf32, #tpu.memory_space<any>>)
    %c2_i32_25 = arith.constant 2 : i32
    %c0_i32_26 = arith.constant 0 : i32
    %c0_i32_27 = arith.constant 0 : i32
    %c0_i32_28 = arith.constant 0 : i32
    %20 = tpu.memref_slice %arg2[%c0_i32_27, %c0_i32_28] : memref<2x512xf32, #tpu.memory_space<any>> -> memref<2x512xf32, #tpu.memory_space<any>>
    %c0_i32_29 = arith.constant 0 : i32
    %c2560_i32_30 = arith.constant 2560 : i32
    %21 = tpu.memref_slice %arg3[%c0_i32_29, %c2560_i32_30] : memref<2x3072xf32, #tpu.memory_space<any>> -> memref<2x512xf32, #tpu.memory_space<any>>
    %22 = tpu.memref_slice %arg4[%c2_i32_25, %c0_i32_26] : memref<3x1x!tpu.dma_semaphore, #tpu.memory_space<semaphore_mem>> -> memref<1x1x!tpu.dma_semaphore, #tpu.memory_space<semaphore_mem>>
    %23 = tpu.memref_squeeze %22 : memref<1x1x!tpu.dma_semaphore, #tpu.memory_space<semaphore_mem>> -> memref<!tpu.dma_semaphore, #tpu.memory_space<semaphore_mem>>
    tpu.wait_dma2 semaphore(%23 : memref<!tpu.dma_semaphore, #tpu.memory_space<semaphore_mem>>) src(%20 : memref<2x512xf32, #tpu.memory_space<any>>) dst(%21 : memref<2x512xf32, #tpu.memory_space<any>>)
    return
  }
}

</mosaic_0001>

<bundles_post_ra>
// kernel: tpu_custom_call.1
= control target key start
LH: loop header
LB: loop body
LE: loop exit
PB: predicated region body
PF: predicated region fallthrough
CT: control target
= control target key end

     0   :  { %s77_s15 = smov [#allocation2]   ;;  %s78_s16 = smov 131072   ;;  %s120_s0 = inlined_call_operand.hbm [shape: f32[2,1024], index: 0, kind: input, shape index: {}]   ;;  %s121_s3 = inlined_call_operand.hbm [shape: f32[2,3072], index: 3, kind: output, shape index: {}]   ;;  %s122_s1 = inlined_call_operand.hbm [shape: f32[2,1536], index: 1, kind: input, shape index: {}]   ;;  %s123_s2 = inlined_call_operand.hbm [shape: f32[2,512], index: 2, kind: input, shape index: {}]  }
   0x1   :  { %s15_s14 = scalar_lea.hbm %s121_s3, 256  ;;  %s79_s17 = smov 0  }
   0x2   :  { %14 = dma.general %s120_s0, 256, %s121_s3, %s77_s15, %s78_s16, [#allocation4], %s79_s17, 0  }
   0x3   :  { %s24_s24 = scalar_lea.hbm %s121_s3, 640  ;;  %s80_s25 = smov [#allocation2 + $0x1]  }
   0x4   :  { %23 = dma.general %s122_s1, 384, %s15_s14, %s80_s25, %s78_s16, [#allocation6], %s79_s17, 0  }
   0x5   :  { %s81_s28 = smov [#allocation2 + $0x2]  }
   0x6   :  { %32 = dma.general %s123_s2, 128, %s24_s24, %s81_s28, %s78_s16, [#allocation8], %s79_s17, 0  }
   0x7   :  { %71 = dma.done.wait [#allocation2], 256 }
   0x8   :  { %72 = vsyncadd [#allocation2], 4294967040 }
   0x9   :  { %73 = dma.done.wait [#allocation2 + $0x1], 384 }
   0xa   :  { %74 = vsyncadd [#allocation2 + $0x1], 4294966912 }
   0xb   :  { %75 = dma.done.wait [#allocation2 + $0x2], 128 }
   0xc   :  { %76 = vsyncadd [#allocation2 + $0x2], 4294967168 }
   0xd   :  { %43 = vsyncmov [#allocation2] }
  0x10   :  { %s44_s0 = vpop.sfrf %43 }
  0x11   :  { %p63_p0 = scmp.ne.s32.totalorder %s44_s0, 0 }
  0x13   :  { %48 = shalt.err (%p63_p0)  }
  0x14   :  { %50 = vsyncmov [#allocation2 + $0x1] }
  0x17   :  { %s51_s3 = vpop.sfrf %50 }
  0x18   :  { %p64_p1 = scmp.ne.s32.totalorder %s51_s3, 0 }
  0x1a   :  { %55 = shalt.err (%p64_p1)  }
  0x1b   :  { %57 = vsyncmov [#allocation2 + $0x2] }
  0x1e   :  { %s58_s1 = vpop.sfrf %57 }
  0x1f   :  { %p65_p2 = scmp.ne.s32.totalorder %s58_s1, 0 }
  0x21   :  { %62 = shalt.err (%p65_p2)  }

</bundles_post_ra>
